<compile_context>
chip_gen: v5e
topology: v5e:2x2
jax: 0.10.0
libtpu: 0.0.40
codegen_flags: <defaults>
</compile_context>

<pallas_src>
import functools

import jax
import jax.numpy as jnp
from jax.experimental import pallas as pl
from jax.experimental.pallas import tpu as pltpu


def _round_up(x, m):
    return (x + m - 1) // m * m


def _pick_window_batch(n_windows, cap=8):
    # Largest divisor of n_windows that is <= cap (keeps the grid exact).
    for wb in range(min(n_windows, cap), 0, -1):
        if n_windows % wb == 0:
            return wb
    return 1


# ----------------------------------------------------------------------------
# Tiled linear:  y = x @ W + b
# ----------------------------------------------------------------------------
def _linear_kernel(x_ref, w_ref, b_ref, o_ref, acc_ref):
    @pl.when(pl.program_id(2) == 0)
    def _():
        acc_ref[...] = jnp.zeros_like(acc_ref)

    acc_ref[...] += jnp.dot(x_ref[...], w_ref[...],
                            preferred_element_type=jnp.float32)

    @pl.when(pl.program_id(2) == pl.num_programs(2) - 1)
    def _():
        o_ref[...] = (acc_ref[...] + b_ref[...]).astype(o_ref.dtype)


def pallas_linear(x2d, w, b, *, tm=256, tn=256, tk=256):
    """x2d: (M, Cin), w: (Cin, Cout), b: (Cout,) -> (M, Cout)."""
    M, Cin = x2d.shape
    Cout = w.shape[1]
    tm = min(tm, _round_up(M, 8))
    tk = min(tk, _round_up(Cin, 128))
    tn = min(tn, _round_up(Cout, 128))
    Mp, Kp, Np = _round_up(M, tm), _round_up(Cin, tk), _round_up(Cout, tn)

    xp = x2d if (Mp == M and Kp == Cin) else jnp.pad(x2d, ((0, Mp - M), (0, Kp - Cin)))
    wp = w if (Kp == Cin and Np == Cout) else jnp.pad(w, ((0, Kp - Cin), (0, Np - Cout)))
    bp = (b if Np == Cout else jnp.pad(b, (0, Np - Cout))).reshape(1, Np)

    out = pl.pallas_call(
        _linear_kernel,
        grid=(Mp // tm, Np // tn, Kp // tk),
        in_specs=[
            pl.BlockSpec((tm, tk), lambda i, j, k: (i, k)),
            pl.BlockSpec((tk, tn), lambda i, j, k: (k, j)),
            pl.BlockSpec((1, tn), lambda i, j, k: (0, j)),
        ],
        out_specs=pl.BlockSpec((tm, tn), lambda i, j, k: (i, j)),
        out_shape=jax.ShapeDtypeStruct((Mp, Np), x2d.dtype),
        scratch_shapes=[pltpu.VMEM((tm, tn), jnp.float32)],
        compiler_params=pltpu.CompilerParams(
            dimension_semantics=("parallel", "parallel", "arbitrary")),
    )(xp, wp, bp)
    return out[:M, :Cout]


# ----------------------------------------------------------------------------
# Windowed [PATCH] x [PATCH] multi-head attention (WB windows per grid step)
# ----------------------------------------------------------------------------
def _wmsa_kernel(num_heads, head_dim, has_mask, *refs):
    if has_mask:
        qkv_ref, bias_ref, mask_ref, o_ref = refs
    else:
        qkv_ref, bias_ref, o_ref = refs
        mask_ref = None
    C = num_heads * head_dim
    qkv = qkv_ref[0]                # (WB, N, 3C), q already pre-scaled via weights
    bias = bias_ref[...]            # (H, N, N)  -- resident, never broadcast in HBM
    maskv = mask_ref[...] if has_mask else None   # (WB, N, N)

    outs = []
    for h in range(num_heads):
        q = qkv[:, :, h * head_dim:(h + 1) * head_dim]
        k = qkv[:, :, C + h * head_dim:C + (h + 1) * head_dim]
        v = qkv[:, :, 2 * C + h * head_dim:2 * C + (h + 1) * head_dim]
        s = jnp.einsum("wqd,wkd->wqk", q, k, preferred_element_type=jnp.float32)
        s = s + bias[h][None]
        if has_mask:
            s = s + maskv
        m = jnp.max(s, axis=-1, keepdims=True)
        p = jnp.exp(s - m)
        denom = jnp.sum(p, axis=-1, keepdims=True)
        p = p * pl.reciprocal(denom, approx=True)
        outs.append(jnp.einsum("wqk,wkd->wqd", p, v,
                               preferred_element_type=jnp.float32))
    # heads folded back into channels -> lane-dense (WB, N, C) store
    o_ref[0] = jnp.concatenate(outs, axis=-1).astype(o_ref.dtype)


def pallas_window_attention(qkv_win, rel_bias, mask, num_heads):
    """qkv_win: (B, nW, N, 3C); rel_bias: (H, N, N); mask: (nW, N, N) or None."""
    B, nW, N, threeC = qkv_win.shape
    C = threeC // 3
    head_dim = C // num_heads
    WB = _pick_window_batch(nW)
    has_mask = mask is not None
    kernel = functools.partial(_wmsa_kernel, num_heads, head_dim, has_mask)

    in_specs = [
        pl.BlockSpec((1, WB, N, threeC), lambda b, w: (b, w, 0, 0)),
        pl.BlockSpec((num_heads, N, N), lambda b, w: (0, 0, 0)),
    ]
    args = [qkv_win, rel_bias]
    if has_mask:
        in_specs.append(pl.BlockSpec((WB, N, N), lambda b, w: (w, 0, 0)))
        args.append(mask.astype(qkv_win.dtype))

    return pl.pallas_call(
        kernel,
        grid=(B, nW // WB),
        in_specs=in_specs,
        out_specs=pl.BlockSpec((1, WB, N, C), lambda b, w: (b, w, 0, 0)),
        out_shape=jax.ShapeDtypeStruct((B, nW, N, C), qkv_win.dtype),
        compiler_params=pltpu.CompilerParams(
            dimension_semantics=("parallel", "parallel")),
    )(*args)


# ----------------------------------------------------------------------------
# [DET] x [DET]  (optionally x cross [PATCH]) attention
# ----------------------------------------------------------------------------
def _det_attn_kernel(num_heads, head_dim, cross_len, has_mask, *refs):
    idx = 0
    det_ref = refs[idx]; idx += 1
    cross_ref = None
    if cross_len > 0:
        cross_ref = refs[idx]; idx += 1
    mask_ref = None
    if has_mask:
        mask_ref = refs[idx]; idx += 1
    o_ref = refs[idx]

    C = num_heads * head_dim
    det = det_ref[0]                                   # (M, 3C)
    cross = cross_ref[0] if cross_ref is not None else None   # (Nc, 3C)

    outs = []
    for h in range(num_heads):
        q = det[:, h * head_dim:(h + 1) * head_dim]
        kd = det[:, C + h * head_dim:C + (h + 1) * head_dim]
        vd = det[:, 2 * C + h * head_dim:2 * C + (h + 1) * head_dim]
        s_d = jnp.einsum("qd,kd->qk", q, kd, preferred_element_type=jnp.float32)
        if cross is not None:
            kc = cross[:, C + h * head_dim:C + (h + 1) * head_dim]
            vc = cross[:, 2 * C + h * head_dim:2 * C + (h + 1) * head_dim]
            s_c = jnp.einsum("qd,kd->qk", q, kc, preferred_element_type=jnp.float32)
            if has_mask:
                s_c = s_c + mask_ref[0, h, :, :cross_len]
                s_d = s_d + mask_ref[0, h, :, cross_len:]
            m = jnp.maximum(jnp.max(s_c, axis=-1, keepdims=True),
                            jnp.max(s_d, axis=-1, keepdims=True))
            p_c = jnp.exp(s_c - m)
            p_d = jnp.exp(s_d - m)
            denom = (jnp.sum(p_c, axis=-1, keepdims=True)
                     + jnp.sum(p_d, axis=-1, keepdims=True))
            inv = pl.reciprocal(denom, approx=True)
            o_h = (jnp.einsum("qk,kd->qd", p_c, vc, preferred_element_type=jnp.float32)
                   + jnp.einsum("qk,kd->qd", p_d, vd, preferred_element_type=jnp.float32)) * inv
        else:
            if has_mask:
                s_d = s_d + mask_ref[0, h]
            m = jnp.max(s_d, axis=-1, keepdims=True)
            p_d = jnp.exp(s_d - m)
            denom = jnp.sum(p_d, axis=-1, keepdims=True)
            o_h = jnp.einsum("qk,kd->qd", p_d, vd,
                             preferred_element_type=jnp.float32) * pl.reciprocal(denom, approx=True)
        outs.append(o_h)
    o_ref[0] = jnp.concatenate(outs, axis=-1).astype(o_ref.dtype)


def pallas_det_attention(det_qkv, cross_qkv, cross_mask, num_heads):
    """det_qkv: (B, M, 3C); cross_qkv: (B, Nc, 3C)|None; cross_mask: (B, H, M, Nk)|None."""
    B, Md, threeC = det_qkv.shape
    C = threeC // 3
    head_dim = C // num_heads
    cross_len = 0 if cross_qkv is None else cross_qkv.shape[1]
    has_mask = cross_mask is not None
    kernel = functools.partial(_det_attn_kernel, num_heads, head_dim, cross_len, has_mask)

    in_specs = [pl.BlockSpec((1, Md, threeC), lambda b: (b, 0, 0))]
    args = [det_qkv]
    if cross_qkv is not None:
        in_specs.append(pl.BlockSpec((1, cross_len, threeC), lambda b: (b, 0, 0)))
        args.append(cross_qkv)
    if has_mask:
        Nk = cross_mask.shape[-1]
        in_specs.append(pl.BlockSpec((1, num_heads, Md, Nk), lambda b: (b, 0, 0, 0)))
        args.append(cross_mask.astype(det_qkv.dtype))

    return pl.pallas_call(
        kernel,
        grid=(B,),
        in_specs=in_specs,
        out_specs=pl.BlockSpec((1, Md, C), lambda b: (b, 0, 0)),
        out_shape=jax.ShapeDtypeStruct((B, Md, C), det_qkv.dtype),
        compiler_params=pltpu.CompilerParams(dimension_semantics=("parallel",)),
    )(*args)


# ----------------------------------------------------------------------------
# Glue (pure JAX): window partition / reverse, relative position index, params
# ----------------------------------------------------------------------------
def window_partition(x, window_size):
    B, H, W, C = x.shape
    x = x.reshape(B, H // window_size, window_size, W // window_size, window_size, C)
    return x.transpose(0, 1, 3, 2, 4, 5).reshape(-1, window_size, window_size, C)


def window_reverse(windows, window_size, H, W):
    B = windows.shape[0] // ((H // window_size) * (W // window_size))
    x = windows.reshape(B, H // window_size, W // window_size, window_size, window_size, -1)
    return x.transpose(0, 1, 3, 2, 4, 5).reshape(B, H, W, -1)


def window_partition_tokens(x, ws):
    """(B, H, W, C) -> (B, nW, ws*ws, C); same ordering as window_partition."""
    B, H, W, C = x.shape
    x = x.reshape(B, H // ws, ws, W // ws, ws, C)
    x = x.transpose(0, 1, 3, 2, 4, 5)
    return x.reshape(B, (H // ws) * (W // ws), ws * ws, C)


def window_reverse_tokens(xw, ws, H, W):
    """(B, nW, ws*ws, C) -> (B, H, W, C)."""
    B, nW, N, C = xw.shape
    x = xw.reshape(B, H // ws, W // ws, ws, ws, C)
    return x.transpose(0, 1, 3, 2, 4, 5).reshape(B, H, W, C)


def make_relative_position_index(window_size):
    ws_h, ws_w = window_size
    coords = jnp.stack(
        jnp.meshgrid(jnp.arange(ws_h), jnp.arange(ws_w), indexing="ij"))
    coords_flat = coords.reshape(2, -1)
    rel = coords_flat[:, :, None] - coords_flat[:, None, :]
    rel = rel.transpose(1, 2, 0)
    rel = rel.at[:, :, 0].add(ws_h - 1)
    rel = rel.at[:, :, 1].add(ws_w - 1)
    rel = rel.at[:, :, 0].multiply(2 * ws_w - 1)
    return rel.sum(-1)  # (N, N) int32


def init_params(key, dim, window_size, num_heads):
    head_dim = dim // num_heads
    k1, k2, k3 = jax.random.split(key, 3)
    num_rel = (2 * window_size[0] - 1) * (2 * window_size[1] - 1)
    return {
        "dim": dim,
        "window_size": window_size,
        "num_heads": num_heads,
        "scale": head_dim ** (-0.5),
        # qkv: nn.Linear(dim, 3*dim) -> stored transposed (dim, 3*dim)
        "qkv_w": jax.random.normal(k1, (dim, 3 * dim), jnp.float32) * 0.1,
        "qkv_b": jnp.zeros((3 * dim,), jnp.float32),
        # proj: nn.Linear(dim, dim) -> stored transposed (dim, dim)
        "proj_w": jax.random.normal(k2, (dim, dim), jnp.float32) * 0.1,
        "proj_b": jnp.zeros((dim,), jnp.float32),
        "rpb_table": jax.random.normal(k3, (num_rel, num_heads), jnp.float32) * 0.1,
        "rel_index": make_relative_position_index(window_size),
    }


# ----------------------------------------------------------------------------
# Forward pass (mirrors ReconfiguredAttentionModule.forward)
# ----------------------------------------------------------------------------
def ram_forward(params, x, det, mask=None, cross_attn=False, cross_attn_mask=None):
    dim = params["dim"]
    num_heads = params["num_heads"]
    assert params["window_size"][0] == params["window_size"][1]
    ws = params["window_size"][0]
    scale = params["scale"]
    local_N = ws * ws

    # Fold the q * scale multiply into the q columns of the qkv projection
    # (mathematically identical to the reference; removes a per-window VPU mul).
    qkv_w = params["qkv_w"].at[:, :dim].multiply(scale)
    qkv_b = params["qkv_b"].at[:dim].multiply(scale)

    if not cross_attn:
        B, H, W, C = x.shape
        N = H * W
        tokens = jnp.concatenate([x.reshape(B, N, C), det], axis=1)
        full_qkv = pallas_linear(tokens.reshape(-1, C), qkv_w, qkv_b)
        full_qkv = full_qkv.reshape(B, -1, 3 * C)
        patch_qkv, det_qkv = full_qkv[:, :N, :], full_qkv[:, N:, :]
        cross_qkv = None
        ori_N = 0
    else:
        B, H, W, C = x[0].shape
        N = H * W
        _, ori_H, ori_W, _ = x[1].shape
        ori_N = ori_H * ori_W
        tokens = jnp.concatenate(
            [x[0].reshape(B, N, C), x[1].reshape(B, ori_N, C), det], axis=1)
        full_qkv = pallas_linear(tokens.reshape(-1, C), qkv_w, qkv_b)
        full_qkv = full_qkv.reshape(B, -1, 3 * C)
        patch_qkv = full_qkv[:, :N, :]
        cross_qkv = full_qkv[:, N:N + ori_N, :]
        det_qkv = full_qkv[:, N + ori_N:, :]

    # ---------------- [PATCH] x [PATCH] windowed self-attention ----------------
    qkv_win = window_partition_tokens(patch_qkv.reshape(B, H, W, 3 * C), ws)  # (B,nW,N,3C)
    rel_bias = params["rpb_table"][params["rel_index"].reshape(-1)]
    rel_bias = rel_bias.reshape(local_N, local_N, num_heads).transpose(2, 0, 1)  # (H,N,N)
    patch_x = pallas_window_attention(qkv_win, rel_bias, mask, num_heads)  # (B,nW,N,C)
    patch_x = window_reverse_tokens(patch_x, ws, H, W)                     # (B,H,W,C)

    # ---------------- [DET] x [DET] (optionally x cross [PATCH]) ----------------
    M_det = det_qkv.shape[1]
    cm = None
    if cross_attn_mask is not None:
        Nk = ori_N + M_det
        cm = jnp.broadcast_to(cross_attn_mask,
                              (B, num_heads, M_det, Nk)).astype(jnp.float32)
    det_x = pallas_det_attention(det_qkv, cross_qkv, cm, num_heads)        # (B,M_det,C)

    # ---------------- merge + output projection ----------------
    merged = jnp.concatenate([patch_x.reshape(B, N, C), det_x], axis=1)
    out = pallas_linear(merged.reshape(-1, C), params["proj_w"], params["proj_b"])
    out = out.reshape(B, N + M_det, C)
    patch_out = out[:, :N, :].reshape(B, H, W, C)
    det_out = out[:, N:, :]
    return patch_out, det_out


# ----------------------------------------------------------------------------
# Pure-JAX reference (direct translation of the PyTorch forward), for checking.
# ----------------------------------------------------------------------------
def ram_forward_ref(params, x, det, mask=None, cross_attn=False, cross_attn_mask=None):
    dim = params["dim"]
    nh = params["num_heads"]
    ws = params["window_size"][0]
    hd = dim // nh
    scale = params["scale"]
    Nl = ws * ws

    if not cross_attn:
        B, H, W, C = x.shape
        N = H * W
        tokens = jnp.concatenate([x.reshape(B, N, C), det], axis=1)
        full = tokens @ params["qkv_w"] + params["qkv_b"]
        patch_qkv, det_qkv = full[:, :N], full[:, N:]
        cross_qkv = None
    else:
        B, H, W, C = x[0].shape
        N = H * W
        _, oH, oW, _ = x[1].shape
        oN = oH * oW
        tokens = jnp.concatenate([x[0].reshape(B, N, C), x[1].reshape(B, oN, C), det], axis=1)
        full = tokens @ params["qkv_w"] + params["qkv_b"]
        patch_qkv = full[:, :N]
        cross_qkv = full[:, N:N + oN]
        det_qkv = full[:, N + oN:]

    pw = window_partition(patch_qkv.reshape(B, H, W, 3 * C), ws)
    B_ = pw.shape[0]
    pw = pw.reshape(B_, Nl, 3, nh, hd).transpose(2, 0, 3, 1, 4)
    q, k, v = pw[0] * scale, pw[1], pw[2]
    attn = jnp.einsum("bhqd,bhkd->bhqk", q, k)
    rel = params["rpb_table"][params["rel_index"].reshape(-1)]
    rel = rel.reshape(Nl, Nl, nh).transpose(2, 0, 1)
    attn = attn + rel[None]
    if mask is not None:
        nW = mask.shape[0]
        attn = attn.reshape(B_ // nW, nW, nh, Nl, Nl) + mask[None, :, None]
        attn = attn.reshape(B_, nh, Nl, Nl)
    attn = jax.nn.softmax(attn, axis=-1)
    px = jnp.einsum("bhqk,bhkd->bhqd", attn, v).transpose(0, 2, 1, 3).reshape(B_, ws, ws, C)

    Md = det_qkv.shape[1]
    dq = det_qkv.reshape(B, Md, 3, nh, hd).transpose(2, 0, 3, 1, 4)
    q, k, v = dq[0] * scale, dq[1], dq[2]
    if cross_attn:
        cq = cross_qkv.reshape(B, -1, 3, nh, hd)
        ck = cq[:, :, 1].transpose(0, 2, 1, 3)
        cv = cq[:, :, 2].transpose(0, 2, 1, 3)
        k = jnp.concatenate([ck, k], axis=2)
        v = jnp.concatenate([cv, v], axis=2)
    attn = jnp.einsum("bhqd,bhkd->bhqk", q, k)
    if cross_attn_mask is not None:
        attn = attn + cross_attn_mask
    attn = jax.nn.softmax(attn, axis=-1)
    dx = jnp.einsum("bhqk,bhkd->bhqd", attn, v).transpose(0, 2, 1, 3).reshape(B, Md, C)

    px = window_reverse(px, ws, H, W)
    merged = jnp.concatenate([px.reshape(B, N, C), dx], axis=1)
    out = merged @ params["proj_w"] + params["proj_b"]
    return out[:, :N].reshape(B, H, W, C), out[:, N:]


def _max_rel_err(a, b):
    return float(jnp.max(jnp.abs(a - b)) / (jnp.max(jnp.abs(b)) + 1e-6))


# ----------------------------------------------------------------------------
if __name__ == "__main__":
    key = jax.random.PRNGKey(0)
    k_par, k_x, k_det, k_mask, k_cross = jax.random.split(key, 5)

    B, H, W, C = 2, 8, 8, 32
    num_heads = 4
    window = 4
    num_det = 8
    nW = (H // window) * (W // window)
    N_local = window * window

    params = init_params(k_par, C, (window, window), num_heads)
    x = jax.random.normal(k_x, (B, H, W, C), jnp.float32)
    det = jax.random.normal(k_det, (B, num_det, C), jnp.float32)

    # 1) plain windowed self-attention path
    p_out, d_out = ram_forward(params, x, det)
    jax.block_until_ready((p_out, d_out))
    p_ref, d_ref = ram_forward_ref(params, x, det)
    assert p_out.shape == (B, H, W, C) and d_out.shape == (B, num_det, C)
    assert _max_rel_err(p_out, p_ref) < 5e-2 and _max_rel_err(d_out, d_ref) < 5e-2

    # 2) shifted-window mask path
    mask = jnp.where(jax.random.uniform(k_mask, (nW, N_local, N_local)) > 0.25, 0.0, -100.0)
    p_out, d_out = ram_forward(params, x, det, mask=mask)
    jax.block_until_ready((p_out, d_out))
    p_ref, d_ref = ram_forward_ref(params, x, det, mask=mask)
    assert _max_rel_err(p_out, p_ref) < 5e-2 and _max_rel_err(d_out, d_ref) < 5e-2

    # 3) cross-attention ([DET] x cross [PATCH]) path
    x_cross = jax.random.normal(k_cross, (B, H, W, C), jnp.float32)
    p_out, d_out = ram_forward(params, (x, x_cross), det, cross_attn=True)
    jax.block_until_ready((p_out, d_out))
    p_ref, d_ref = ram_forward_ref(params, (x, x_cross), det, cross_attn=True)
    assert p_out.shape == (B, H, W, C) and d_out.shape == (B, num_det, C)
    assert _max_rel_err(p_out, p_ref) < 5e-2 and _max_rel_err(d_out, d_ref) < 5e-2

    print("KERNEL_OK")
</pallas_src>

<mosaic_0001>
module attributes {stable_mosaic.version = 11 : i64} {
  func.func @_linear_kernel(%arg0: i32, %arg1: i32, %arg2: i32, %arg3: memref<144x128xf32, #tpu.memory_space<vmem>>, %arg4: memref<128x128xf32, #tpu.memory_space<vmem>>, %arg5: memref<1x128xf32, #tpu.memory_space<vmem>>, %arg6: memref<144x128xf32, #tpu.memory_space<vmem>>, %arg7: memref<144x128xf32, #tpu.memory_space<vmem>>) attributes {dimension_semantics = [#tpu.dimension_semantics<parallel>, #tpu.dimension_semantics<parallel>, #tpu.dimension_semantics<arbitrary>], iteration_bounds = array<i64: 1, 1, 1>, scalar_prefetch = 0 : i64, scratch_operands = 1 : i64, tpu.core_type = #tpu.core_type<tc>, window_params = [{transform_indices = @transform_0, window_bounds = array<i64: 144, 128>}, {transform_indices = @transform_1, window_bounds = array<i64: 128, 128>}, {transform_indices = @transform_2, window_bounds = array<i64: 1, 128>}, {transform_indices = @transform_3, window_bounds = array<i64: 144, 128>}]} {
    %c0_i32 = arith.constant 0 : i32
    %0 = arith.cmpi eq, %arg2, %c0_i32 : i32
    %1 = arith.extui %0 : i1 to i32
    %c0_i32_0 = arith.constant 0 : i32
    %2 = arith.cmpi ne, %1, %c0_i32_0 : i32
    scf.if %2 {
      %cst_10 = arith.constant 0.000000e+00 : f32
      %12 = vector.broadcast %cst_10 : f32 to vector<144x128xf32>
      %c0_11 = arith.constant 0 : index
      %c0_12 = arith.constant 0 : index
      %13 = vector.load %arg7[%c0_11, %c0_12] : memref<144x128xf32, #tpu.memory_space<vmem>>, vector<144x128xf32>
      tpu.vector_store %arg7[%c0_11, %c0_12], %12 {strides = array<i32>} : memref<144x128xf32, #tpu.memory_space<vmem>>, vector<144x128xf32>,
    } else {
    }
    %c0 = arith.constant 0 : index
    %c0_1 = arith.constant 0 : index
    %3 = vector.load %arg7[%c0, %c0_1] : memref<144x128xf32, #tpu.memory_space<vmem>>, vector<144x128xf32>
    %c0_2 = arith.constant 0 : index
    %c0_3 = arith.constant 0 : index
    %4 = vector.load %arg3[%c0_2, %c0_3] : memref<144x128xf32, #tpu.memory_space<vmem>>, vector<144x128xf32>
    %c0_4 = arith.constant 0 : index
    %c0_5 = arith.constant 0 : index
    %5 = vector.load %arg4[%c0_4, %c0_5] : memref<128x128xf32, #tpu.memory_space<vmem>>, vector<128x128xf32>
    %cst = arith.constant dense<0.000000e+00> : vector<144x128xf32>
    %6 = tpu.matmul %4, %5, %cst {dimension_numbers = #tpu.dot_dimension_numbers<[1], [0], [0], [1], [0, 0, 1, 1], [], []>} : vector<144x128xf32>, vector<128x128xf32>, vector<144x128xf32> -> vector<144x128xf32>
    %7 = arith.addf %3, %6 : vector<144x128xf32>
    %c0_6 = arith.constant 0 : index
    %c0_7 = arith.constant 0 : index
    %8 = vector.load %arg7[%c0_6, %c0_7] : memref<144x128xf32, #tpu.memory_space<vmem>>, vector<144x128xf32>
    tpu.vector_store %arg7[%c0_6, %c0_7], %7 {strides = array<i32>} : memref<144x128xf32, #tpu.memory_space<vmem>>, vector<144x128xf32>,
    %c0_i32_8 = arith.constant 0 : i32
    %9 = arith.cmpi eq, %arg2, %c0_i32_8 : i32
    %10 = arith.extui %9 : i1 to i32
    %c0_i32_9 = arith.constant 0 : i32
    %11 = arith.cmpi ne, %10, %c0_i32_9 : i32
    scf.if %11 {
      %c0_10 = arith.constant 0 : index
      %c0_11 = arith.constant 0 : index
      %12 = vector.load %arg7[%c0_10, %c0_11] : memref<144x128xf32, #tpu.memory_space<vmem>>, vector<144x128xf32>
      %c0_12 = arith.constant 0 : index
      %c0_13 = arith.constant 0 : index
      %13 = vector.load %arg5[%c0_12, %c0_13] : memref<1x128xf32, #tpu.memory_space<vmem>>, vector<1x128xf32>
      %14 = vector.broadcast %13 : vector<1x128xf32> to vector<144x128xf32>
      %15 = arith.addf %12, %14 : vector<144x128xf32>
      %c0_14 = arith.constant 0 : index
      %c0_15 = arith.constant 0 : index
      %16 = vector.load %arg6[%c0_14, %c0_15] : memref<144x128xf32, #tpu.memory_space<vmem>>, vector<144x128xf32>
      tpu.vector_store %arg6[%c0_14, %c0_15], %15 {strides = array<i32>} : memref<144x128xf32, #tpu.memory_space<vmem>>, vector<144x128xf32>,
    } else {
    }
    return
  }
  func.func @transform_0(%arg0: i32, %arg1: i32, %arg2: i32) -> (i32, i32) {
    %c0_i32 = arith.constant 0 : i32
    return %arg0, %arg2 : i32, i32
  }
  func.func @transform_1(%arg0: i32, %arg1: i32, %arg2: i32) -> (i32, i32) {
    %c0_i32 = arith.constant 0 : i32
    return %arg2, %arg1 : i32, i32
  }
  func.func @transform_2(%arg0: i32, %arg1: i32, %arg2: i32) -> (i32, i32) {
    %c0_i32 = arith.constant 0 : i32
    %c0_i32_0 = arith.constant 0 : i32
    return %c0_i32, %arg1 : i32, i32
  }
  func.func @transform_3(%arg0: i32, %arg1: i32, %arg2: i32) -> (i32, i32) {
    %c0_i32 = arith.constant 0 : i32
    return %arg0, %arg1 : i32, i32
  }
}

</mosaic_0001>

<bundles_post_ra>
// kernel: tpu_custom_call.1
= control target key start
LH: loop header
LB: loop body
LE: loop exit
PB: predicated region body
PF: predicated region fallthrough
CT: control target
= control target key end

     0   :  { %8 = vsyncpa [#allocation4], 0  ;;  %s487_s0 = inlined_call_operand.hbm [shape: f32[144,128], index: 0, kind: input, shape index: {}]   ;;  %s488_s1 = inlined_call_operand.hbm [shape: f32[128,128], index: 1, kind: input, shape index: {}]   ;;  %s489_s2 = inlined_call_operand.vmem [shape: f32[1,128], index: 2, kind: input, shape index: {}]   ;;  %s490_s3 = inlined_call_operand.hbm [shape: f32[144,128], index: 3, kind: output, shape index: {}]  }
   0x1   :  { %9 = vsyncpa [#allocation7], 0 }
   0x2   :  { %10 = vsyncpa [#allocation5], 0  ;;  %s15_s14 = sshll.u32 %s487_s0, 4  ;;  %s441_s15 = smov [#allocation3]   ;;  %s16_s14 = int_to_ptr.hbm [resolvable:$true] %s15_s14 }
   0x3   :  { %s17_s16 = sshll.u32 %s441_s15, 4  ;;  %s28_s19 = sshll.u32 %s488_s1, 4  ;;  %s18_s16 = int_to_ptr.vmem [resolvable:$true] %s17_s16  ;;  %s29_s19 = int_to_ptr.hbm [resolvable:$true] %s28_s19 }
   0x4   :  { %s442_s20 = smov 128   ;;  %s443_s21 = smov 8  }
   0x5   :  { %23 = dma.hbm_to_vmem [thread:$0]  %s16_s14, 2304, %s18_s16, [#allocation4], %s442_s20, %s442_s20, %s443_s21  }
   0x6   :  { %s444_s22 = smov [#allocation6]  }
   0x7   :  { %s30_s23 = sshll.u32 %s444_s22, 4  ;;  %s31_s23 = int_to_ptr.vmem [resolvable:$true] %s30_s23 }
   0x8   :  { %36 = dma.hbm_to_vmem [thread:$0]  %s29_s19, 2048, %s31_s23, [#allocation7], %s442_s20, %s442_s20, %s443_s21  }
   0x9   :  { %435 = dma.done.wait [#allocation4], 2304  }
   0xa   :  { %436 = vsyncadd [#allocation4], 4294964992 }
   0xb   :  { %437 = dma.done.wait [#allocation7], 2048  }
   0xc   :  { %438 = vsyncadd [#allocation7], 4294965248  ;;  %v120_v0 = vld [vmem:[#allocation6 + $0x78] sm:$0xff]  ;;  %v119_v1 = vld [vmem:[#allocation6 + $0x70] sm:$0xff]  ;;  %s295_s27 = sshll.u32 %s490_s3, 4  ;;  %s296_s27 = int_to_ptr.hbm [resolvable:$true] %s295_s27 }
   0xd   :  { %310 = vmatpush.msra.mxu2 %v120_v0  ;;  %311 = vmatpush.msra.mxu3 %v120_v0  ;;  %v118_v2 = vld [vmem:[#allocation6 + $0x68] sm:$0xff]  ;;  %v117_v3 = vld [vmem:[#allocation6 + $0x60] sm:$0xff]  ;;  %v116_v4 = vld [vmem:[#allocation6 + $0x58] sm:$0xff] }
   0xe   :  { %121 = vmatpush.msra.mxu0 %v120_v0  ;;  %309 = vmatpush.msra.mxu1 %v120_v0  ;;  %v115_v5 = vld [vmem:[#allocation6 + $0x50] sm:$0xff]  ;;  %v114_v6 = vld [vmem:[#allocation6 + $0x48] sm:$0xff]  ;;  %v113_v7 = vld [vmem:[#allocation6 + $0x40] sm:$0xff] }
   0xf   :  { %313 = vmatpush.msra.mxu2 %v119_v1  ;;  %314 = vmatpush.msra.mxu3 %v119_v1  ;;  %v112_v8 = vld [vmem:[#allocation6 + $0x38] sm:$0xff]  ;;  %v111_v9 = vld [vmem:[#allocation6 + $0x30] sm:$0xff]  ;;  %v110_v10 = vld [vmem:[#allocation6 + $0x28] sm:$0xff] }
  0x10   :  { %122 = vmatpush.msra.mxu0 %v119_v1  ;;  %312 = vmatpush.msra.mxu1 %v119_v1  ;;  %v109_v11 = vld [vmem:[#allocation6 + $0x20] sm:$0xff]  ;;  %v108_v12 = vld [vmem:[#allocation6 + $0x18] sm:$0xff]  ;;  %v107_v13 = vld [vmem:[#allocation6 + $0x10] sm:$0xff] }
  0x11   :  { %316 = vmatpush.msra.mxu2 %v118_v2  ;;  %317 = vmatpush.msra.mxu3 %v118_v2  ;;  %v106_v14 = vld [vmem:[#allocation6 + $0x8] sm:$0xff]  ;;  %v105_v15 = vld [vmem:[#allocation6] sm:$0xff]  ;;  %v95_v16 = vld [vmem:[#allocation3 + $0x40] sm:$0xff] }
  0x12   :  { %123 = vmatpush.msra.mxu0 %v118_v2  ;;  %315 = vmatpush.msra.mxu1 %v118_v2  ;;  %v100_v17 = vld [vmem:[#allocation3 + $0x68] sm:$0xff]  ;;  %v87_v18 = vld [vmem:[#allocation3] sm:$0xff]  ;;  %v101_v21 = vld [vmem:[#allocation3 + $0x70] sm:$0xff] }
  0x13   :  { %319 = vmatpush.msra.mxu2 %v117_v3  ;;  %320 = vmatpush.msra.mxu3 %v117_v3  ;;  %v91_v19 = vld [vmem:[#allocation3 + $0x20] sm:$0xff]  ;;  %v96_v20 = vld [vmem:[#allocation3 + $0x48] sm:$0xff]  ;;  %v97_v24 = vld [vmem:[#allocation3 + $0x50] sm:$0xff] }
  0x14   :  { %124 = vmatpush.msra.mxu0 %v117_v3  ;;  %318 = vmatpush.msra.mxu1 %v117_v3  ;;  %v88_v22 = vld [vmem:[#allocation3 + $0x8] sm:$0xff]  ;;  %v102_v25 = vld [vmem:[#allocation3 + $0x78] sm:$0xff]  ;;  %v89_v26 = vld [vmem:[#allocation3 + $0x10] sm:$0xff] }
  0x15   :  { %322 = vmatpush.msra.mxu2 %v116_v4  ;;  %323 = vmatpush.msra.mxu3 %v116_v4  ;;  %v92_v23 = vld [vmem:[#allocation3 + $0x28] sm:$0xff]  ;;  %v93_v27 = vld [vmem:[#allocation3 + $0x30] sm:$0xff]  ;;  %v98_v28 = vld [vmem:[#allocation3 + $0x58] sm:$0xff] }
  0x16   :  { %125 = vmatpush.msra.mxu0 %v116_v4  ;;  %321 = vmatpush.msra.mxu1 %v116_v4  ;;  %v103_v29 = vld [vmem:[#allocation3 + $0x80] sm:$0xff]  ;;  %v90_v30 = vld [vmem:[#allocation3 + $0x18] sm:$0xff]  ;;  %v104_v33 = vld [vmem:[#allocation3 + $0x88] sm:$0xff] }
  0x17   :  { %325 = vmatpush.msra.mxu2 %v115_v5  ;;  %326 = vmatpush.msra.mxu3 %v115_v5  ;;  %v94_v31 = vld [vmem:[#allocation3 + $0x38] sm:$0xff]  ;;  %v99_v32 = vld [vmem:[#allocation3 + $0x60] sm:$0xff] }
  0x18   :  { %126 = vmatpush.msra.mxu0 %v115_v5  ;;  %324 = vmatpush.msra.mxu1 %v115_v5  ;;  %v362_v34 = vld [vmem:[%s489_s2] ss:$0 sm:$0xff]  ;;  %s445_s2 = smov [#allocation8]  }
  0x19   :  { %328 = vmatpush.msra.mxu2 %v114_v6  ;;  %329 = vmatpush.msra.mxu3 %v114_v6  ;;  %s293_s24 = sshll.u32 %s445_s2, 4  ;;  %s294_s24 = int_to_ptr.vmem [resolvable:$true] %s293_s24 }
  0x1a   :  { %127 = vmatpush.msra.mxu0 %v114_v6  ;;  %327 = vmatpush.msra.mxu1 %v114_v6 }
  0x1b   :  { %331 = vmatpush.msra.mxu2 %v113_v7  ;;  %332 = vmatpush.msra.mxu3 %v113_v7 }
  0x1c   :  { %128 = vmatpush.msra.mxu0 %v113_v7  ;;  %330 = vmatpush.msra.mxu1 %v113_v7 }
  0x1d   :  { %334 = vmatpush.msra.mxu2 %v112_v8  ;;  %335 = vmatpush.msra.mxu3 %v112_v8 }
  0x1e   :  { %129 = vmatpush.msra.mxu0 %v112_v8  ;;  %333 = vmatpush.msra.mxu1 %v112_v8 }
  0x1f   :  { %337 = vmatpush.msra.mxu2 %v111_v9  ;;  %338 = vmatpush.msra.mxu3 %v111_v9 }
  0x20   :  { %130 = vmatpush.msra.mxu0 %v111_v9  ;;  %336 = vmatpush.msra.mxu1 %v111_v9 }
  0x21   :  { %340 = vmatpush.msra.mxu2 %v110_v10  ;;  %341 = vmatpush.msra.mxu3 %v110_v10 }
  0x22   :  { %131 = vmatpush.msra.mxu0 %v110_v10  ;;  %339 = vmatpush.msra.mxu1 %v110_v10 }
  0x23   :  { %343 = vmatpush.msra.mxu2 %v109_v11  ;;  %344 = vmatpush.msra.mxu3 %v109_v11 }
  0x24   :  { %132 = vmatpush.msra.mxu0 %v109_v11  ;;  %342 = vmatpush.msra.mxu1 %v109_v11 }
  0x25   :  { %346 = vmatpush.msra.mxu2 %v108_v12  ;;  %347 = vmatpush.msra.mxu3 %v108_v12 }
  0x26   :  { %133 = vmatpush.msra.mxu0 %v108_v12  ;;  %345 = vmatpush.msra.mxu1 %v108_v12 }
  0x27   :  { %349 = vmatpush.msra.mxu2 %v107_v13  ;;  %350 = vmatpush.msra.mxu3 %v107_v13 }
  0x28   :  { %134 = vmatpush.msra.mxu0 %v107_v13  ;;  %348 = vmatpush.msra.mxu1 %v107_v13 }
  0x29   :  { %352 = vmatpush.msra.mxu2 %v106_v14  ;;  %353 = vmatpush.msra.mxu3 %v106_v14 }
  0x2a   :  { %135 = vmatpush.msra.mxu0 %v106_v14  ;;  %351 = vmatpush.msra.mxu1 %v106_v14 }
  0x2b   :  { %355 = vmatpush.msra.mxu2 %v105_v15  ;;  %356 = vmatpush.msra.mxu3 %v105_v15 }
  0x2c   :  { %161 = vmatmul.f32.vlgmr.msra.gmra.mxu2 %v95_v16  ;;  %176 = vmatmul.f32.vlgmr.msra.gmra.mxu3 %v100_v17 }
  0x2d   :  { %136 = vmatpush.msra.mxu0 %v105_v15  ;;  %354 = vmatpush.msra.mxu1 %v105_v15 }
  0x2e   :  { %137 = vmatmul.f32.vlgmr.msra.gmra.mxu0 %v87_v18  ;;  %149 = vmatmul.f32.vlgmr.msra.gmra.mxu1 %v91_v19 }
  0x34   :  { %164 = vmatmul.f32.gmra.mxu2 %v96_v20  ;;  %179 = vmatmul.f32.gmra.mxu3 %v101_v21 }
  0x36   :  { %140 = vmatmul.f32.gmra.mxu0 %v88_v22  ;;  %152 = vmatmul.f32.gmra.mxu1 %v92_v23 }
  0x3c   :  { %167 = vmatmul.f32.gmra.mxu2 %v97_v24  ;;  %182 = vmatmul.f32.gmra.mxu3 %v102_v25 }
  0x3e   :  { %143 = vmatmul.f32.gmra.mxu0 %v89_v26  ;;  %155 = vmatmul.f32.gmra.mxu1 %v93_v27 }
  0x44   :  { %170 = vmatmul.f32.gmra.mxu2 %v98_v28  ;;  %185 = vmatmul.f32.gmra.mxu3 %v103_v29 }
  0x46   :  { %146 = vmatmul.f32.gmra.mxu0 %v90_v30  ;;  %158 = vmatmul.f32.gmra.mxu1 %v94_v31 }
  0x4c   :  { %173 = vmatmul.f32.gmra.mxu2 %v99_v32  ;;  %188 = vmatmul.f32.gmra.mxu3 %v104_v33 }
  0xab   :  { %v138_v35 = vpop.f32.mrf.mxu0  ;;  %v150_v36 = vpop.f32.mrf.mxu1 }
  0xac   :  { %v253_v37 = vadd.f32 %v362_v34, %v138_v35  ;;  %v257_v38 = vadd.f32 %v362_v34, %v150_v36 }
  0xae   :  { %271 = vst [vmem:[#allocation8] sm:$0xff] %v253_v37 }
  0xaf   :  { %v162_v39 = vpop.f32.mrf.mxu2  ;;  %v177_v40 = vpop.f32.mrf.mxu3  ;;  %275 = vst [vmem:[#allocation8 + $0x20] sm:$0xff] %v257_v38 }
  0xb0   :  { %v261_v41 = vadd.f32 %v362_v34, %v162_v39  ;;  %v266_v42 = vadd.f32 %v362_v34, %v177_v40 }
  0xb2   :  { %279 = vst [vmem:[#allocation8 + $0x40] sm:$0xff] %v261_v41 }
  0xb3   :  { %284 = vst [vmem:[#allocation8 + $0x68] sm:$0xff] %v266_v42  ;;  %v141_v43 = vpop.f32.mrf.mxu0  ;;  %v153_v44 = vpop.f32.mrf.mxu1 }
  0xb4   :  { %v254_v45 = vadd.f32 %v362_v34, %v141_v43  ;;  %v258_v46 = vadd.f32 %v362_v34, %v153_v44 }
  0xb6   :  { %272 = vst [vmem:[#allocation8 + $0x8] sm:$0xff] %v254_v45 }
  0xb7   :  { %v165_v47 = vpop.f32.mrf.mxu2  ;;  %v180_v48 = vpop.f32.mrf.mxu3  ;;  %276 = vst [vmem:[#allocation8 + $0x28] sm:$0xff] %v258_v46 }
  0xb8   :  { %v262_v49 = vadd.f32 %v362_v34, %v165_v47  ;;  %v267_v50 = vadd.f32 %v362_v34, %v180_v48 }
  0xba   :  { %280 = vst [vmem:[#allocation8 + $0x48] sm:$0xff] %v262_v49 }
  0xbb   :  { %285 = vst [vmem:[#allocation8 + $0x70] sm:$0xff] %v267_v50  ;;  %v144_v51 = vpop.f32.mrf.mxu0  ;;  %v156_v52 = vpop.f32.mrf.mxu1 }
  0xbc   :  { %v255_v53 = vadd.f32 %v362_v34, %v144_v51  ;;  %v259_v54 = vadd.f32 %v362_v34, %v156_v52 }
  0xbe   :  { %273 = vst [vmem:[#allocation8 + $0x10] sm:$0xff] %v255_v53 }
  0xbf   :  { %v168_v55 = vpop.f32.mrf.mxu2  ;;  %v183_v56 = vpop.f32.mrf.mxu3  ;;  %277 = vst [vmem:[#allocation8 + $0x30] sm:$0xff] %v259_v54 }
  0xc0   :  { %v263_v57 = vadd.f32 %v362_v34, %v168_v55  ;;  %v268_v58 = vadd.f32 %v362_v34, %v183_v56 }
  0xc2   :  { %281 = vst [vmem:[#allocation8 + $0x50] sm:$0xff] %v263_v57 }
  0xc3   :  { %286 = vst [vmem:[#allocation8 + $0x78] sm:$0xff] %v268_v58  ;;  %v147_v59 = vpop.f32.mrf.mxu0  ;;  %v159_v60 = vpop.f32.mrf.mxu1 }
  0xc4   :  { %v256_v61 = vadd.f32 %v362_v34, %v147_v59  ;;  %v260_v62 = vadd.f32 %v362_v34, %v159_v60 }
  0xc6   :  { %274 = vst [vmem:[#allocation8 + $0x18] sm:$0xff] %v256_v61 }
  0xc7   :  { %v171_v63 = vpop.f32.mrf.mxu2  ;;  %v186_v0 = vpop.f32.mrf.mxu3  ;;  %278 = vst [vmem:[#allocation8 + $0x38] sm:$0xff] %v260_v62 }
  0xc8   :  { %v264_v1 = vadd.f32 %v362_v34, %v171_v63  ;;  %v269_v2 = vadd.f32 %v362_v34, %v186_v0 }
  0xca   :  { %282 = vst [vmem:[#allocation8 + $0x58] sm:$0xff] %v264_v1 }
  0xcb   :  { %287 = vst [vmem:[#allocation8 + $0x80] sm:$0xff] %v269_v2 }
  0xcf   :  { %v174_v3 = vpop.f32.mrf.mxu2  ;;  %v189_v4 = vpop.f32.mrf.mxu3 }
  0xd0   :  { %v265_v5 = vadd.f32 %v362_v34, %v174_v3  ;;  %v270_v6 = vadd.f32 %v362_v34, %v189_v4 }
  0xd2   :  { %283 = vst [vmem:[#allocation8 + $0x60] sm:$0xff] %v265_v5 }
  0xd3   :  { %288 = vst [vmem:[#allocation8 + $0x88] sm:$0xff] %v270_v6 }
  0xd4   :  { %301 = dma.vmem_to_hbm [thread:$0]  %s294_s24, 2304, %s296_s27, [#allocation5], %s442_s20, %s442_s20, %s443_s21  }
  0xd5   :  { %439 = dma.done.wait [#allocation5], 2304  }
  0xd6   :  { %440 = vsyncadd [#allocation5], 4294964992 }
  0xd7   :  { %306 = vsyncpa [#allocation4], 1 }
  0xd8   :  { %307 = vsyncpa [#allocation7], 1 }
  0xd9   :  { %308 = vsyncpa [#allocation5], 1 }

</bundles_post_ra>
